<compile_context>
chip_gen: v7x
topology: tpu7x:2x2x1
jax: 0.10.0
libtpu: 0.0.40
codegen_flags: <defaults>
</compile_context>

<pallas_src>
import functools

import jax
import jax.numpy as jnp
from jax import lax
from jax.experimental import pallas as pl
from jax.experimental.pallas import tpu as pltpu


def _tcn_fused_kernel(*refs, layer_meta, K, L):
    """Fused TCN forward for one batch tile.

    refs layout (inputs, then output):
      refs[0]                 : x tile                (Cin0, Bt*L)   f32
      then per layer          : w1 (Cout, K*Cin) bf16, b1 (Cout,1) f32,
                                w2 (Cout, K*Cout) bf16, b2 (Cout,1) f32,
                                [wd (Cout, Cin) bf16, bd (Cout,1) f32]  if downsample
      refs[-2]                : PReLU slopes (3*num_layers,) f32     (SMEM)
      refs[-1]                : output tile           (Cout_last, Bt*L) f32
    """
    x_ref = refs[0]
    alphas_ref = refs[-2]
    o_ref = refs[-1]

    Lb = x_ref.shape[-1]
    # Position within each length-L sequence for every lane of the folded (C, Bt*L) tile.
    lane_pos = lax.broadcasted_iota(jnp.int32, (1, Lb), 1) % L

    # Hoisted (1, Lb) causal-validity mask per distinct non-zero shift (JAX does not CSE
    # iota/broadcast work if it is rebuilt inside the layer loop).
    shifts = sorted({(K - 1 - k) * d for (d, _) in layer_meta for k in range(K)} - {0})
    masks = {s: lane_pos >= s for s in shifts}

    def shift_tap(h, s):
        # Causal shift-right by s lanes within each length-L segment: XLU lane rotation
        # + VPU mask.  Lanes with (lane % L) < s read the conv's zero padding; the mask
        # also kills any circular wrap across sequence boundaries.
        if s == 0:
            return h
        rolled = pltpu.roll(h, s, 1)
        return jnp.where(masks[s], rolled, 0.0)

    def causal_conv_prelu(h, w_ref, b_ref, dilation, alpha):
        # Dilated causal conv (conv + chomp) + bias + PReLU as ONE MXU matmul:
        # K shifted taps stacked along sublanes -> contraction dim K*Cin.
        taps = [shift_tap(h, (K - 1 - k) * dilation) for k in range(K)]
        lhs = taps[0] if K == 1 else jnp.concatenate(taps, axis=0)     # (K*Cin, Lb) f32
        acc = jnp.dot(w_ref[...], lhs.astype(jnp.bfloat16),            # bf16 MXU
                      preferred_element_type=jnp.float32)              # (Cout, Lb) f32
        acc = acc + b_ref[...]                                          # f32 bias
        return jnp.where(acc >= 0.0, acc, alpha * acc)                  # f32 PReLU

    h = x_ref[...].astype(jnp.float32)                                  # (Cin0, Lb)
    idx = 1
    for li, (dilation, has_ds) in enumerate(layer_meta):
        w1 = refs[idx]
        b1 = refs[idx + 1]
        w2 = refs[idx + 2]
        b2 = refs[idx + 3]
        idx += 4
        if has_ds:
            wd = refs[idx]
            bd = refs[idx + 1]
            idx += 2
        a1 = alphas_ref[3 * li + 0]
        a2 = alphas_ref[3 * li + 1]
        a3 = alphas_ref[3 * li + 2]

        h1 = causal_conv_prelu(h, w1, b1, dilation, a1)
        h2 = causal_conv_prelu(h1, w2, b2, dilation, a2)

        if has_ds:
            res = jnp.dot(wd[...], h.astype(jnp.bfloat16),
                          preferred_element_type=jnp.float32) + bd[...]
        else:
            res = h
        pre = h2 + res
        h = jnp.where(pre >= 0.0, pre, a3 * pre)                        # block-out PReLU

    o_ref[...] = h.astype(o_ref.dtype)


def _default_batch_tile(B, L):
    """Per-generation default: grid=1 on single-TC chips, 2 parallel tiles on v7x."""
    try:
        kind = jax.devices()[0].device_kind.lower()
    except Exception:  # pragma: no cover - be robust to exotic runtimes
        kind = ""
    two_tensorcores = "7" in kind  # v7x has 2 TensorCores per chip
    if two_tensorcores and B % 2 == 0 and ((B // 2) * L) % 256 == 0:
        return B // 2
    return B


def tcn_forward(x, params, *, K, batch_tile=None):
    """x: (B, Cin, L) f32 -> (B, Cout_last, L) f32 through all TemporalBlocks."""
    B, Cin0, L = x.shape
    Bt = batch_tile if batch_tile is not None else _default_batch_tile(B, L)
    assert B % Bt == 0, "batch must be divisible by batch tile"
    Lb = Bt * L
    if Bt != B:
        # Partial tiles must satisfy the (8,128) lane constraint on the last block dim.
        assert Lb % 128 == 0, "partial batch tiles need 128-lane-aligned Bt*L"
    Cout_last = params[-1]["b1"].shape[0]

    # Fold batch into the lane axis: (B, C, L) -> (C, B*L).  Layout plumbing only.
    x_folded = jnp.transpose(x, (1, 0, 2)).reshape(Cin0, B * L)

    inputs = [x_folded]
    in_specs = [pl.BlockSpec((Cin0, Lb), lambda i: (0, i))]

    layer_meta = []
    alphas = []
    flops = 0
    bytes_accessed = int(x.size) * 4 + B * L * Cout_last * 4
    for p in params:
        inputs += [p["w1"], p["b1"], p["w2"], p["b2"]]
        in_specs += [pl.BlockSpec(p["w1"].shape, lambda i: (0, 0)),
                     pl.BlockSpec(p["b1"].shape, lambda i: (0, 0)),
                     pl.BlockSpec(p["w2"].shape, lambda i: (0, 0)),
                     pl.BlockSpec(p["b2"].shape, lambda i: (0, 0))]
        c_out = p["w1"].shape[0]
        flops += 2 * B * L * c_out * (p["w1"].shape[1] + p["w2"].shape[1])
        bytes_accessed += int(p["w1"].size + p["w2"].size) * 2 \
            + int(p["b1"].size + p["b2"].size) * 4
        if p["has_downsample"]:
            inputs += [p["wd"], p["bd"]]
            in_specs += [pl.BlockSpec(p["wd"].shape, lambda i: (0, 0)),
                         pl.BlockSpec(p["bd"].shape, lambda i: (0, 0))]
            flops += 2 * B * L * p["wd"].shape[0] * p["wd"].shape[1]
            bytes_accessed += int(p["wd"].size) * 2 + int(p["bd"].size) * 4
        layer_meta.append((p["dilation"], p["has_downsample"]))
        alphas.append(p["alphas"])

    alphas_flat = jnp.concatenate(alphas)                      # (3*num_layers,) f32
    inputs.append(alphas_flat)
    in_specs.append(pl.BlockSpec(memory_space=pltpu.MemorySpace.SMEM))
    bytes_accessed += int(alphas_flat.size) * 4

    kernel = functools.partial(_tcn_fused_kernel,
                               layer_meta=tuple(layer_meta), K=K, L=L)

    grid_spec = pltpu.PrefetchScalarGridSpec(
        num_scalar_prefetch=0,
        grid=(B // Bt,),
        in_specs=in_specs,
        out_specs=pl.BlockSpec((Cout_last, Lb), lambda i: (0, i)),
    )

    out_folded = pl.pallas_call(
        kernel,
        out_shape=jax.ShapeDtypeStruct((Cout_last, B * L), x.dtype),
        grid_spec=grid_spec,
        compiler_params=pltpu.CompilerParams(
            dimension_semantics=("parallel",)),
        cost_estimate=pl.CostEstimate(flops=int(flops), transcendentals=0,
                                      bytes_accessed=int(bytes_accessed)),
    )(*inputs)

    return jnp.transpose(out_folded.reshape(Cout_last, B, L), (1, 0, 2))


def init_tcn_params(key, num_inputs, num_channels, kernel_size):
    """Deterministic parameter init mirroring TemporalConvNet.__init__ shapes."""
    params = []
    for i, c_out in enumerate(num_channels):
        c_in = num_inputs if i == 0 else num_channels[i - 1]
        key, k1, k2, k3, kb1, kb2, kb3 = jax.random.split(key, 7)
        w1 = 0.01 * jax.random.normal(k1, (c_out, c_in, kernel_size), jnp.float32)
        w2 = 0.01 * jax.random.normal(k2, (c_out, c_out, kernel_size), jnp.float32)
        b1 = 0.01 * jax.random.normal(kb1, (c_out,), jnp.float32)
        b2 = 0.01 * jax.random.normal(kb2, (c_out,), jnp.float32)
        has_ds = c_in != c_out
        p = dict(
            # Fused-tap layout (Cout, K*Cin): column block k holds PyTorch kernel index
            # k, which pairs with causal shift (K-1-k)*dilation.  bf16 = MXU native.
            w1=jnp.transpose(w1, (0, 2, 1)).reshape(c_out, kernel_size * c_in)
                 .astype(jnp.bfloat16),
            b1=b1[:, None],
            w2=jnp.transpose(w2, (0, 2, 1)).reshape(c_out, kernel_size * c_out)
                 .astype(jnp.bfloat16),
            b2=b2[:, None],
            alphas=jnp.full((3,), 0.25, jnp.float32),          # nn.PReLU() default
            has_downsample=has_ds,
            dilation=2 ** i,
        )
        if has_ds:
            wd = 0.01 * jax.random.normal(k3, (c_out, c_in), jnp.float32)
            bd = 0.01 * jax.random.normal(kb3, (c_out,), jnp.float32)
            p["wd"] = wd.astype(jnp.bfloat16)
            p["bd"] = bd[:, None]
        params.append(p)
    return params


def _fused_to_conv_weight(w2d, K):
    """(Cout, K*Cin) fused layout -> (Cout, Cin, K) conv layout."""
    c_out, kc = w2d.shape
    c_in = kc // K
    return jnp.transpose(w2d.reshape(c_out, K, c_in), (0, 2, 1))


def tcn_reference(x, params, *, K):
    """Pure-JAX reference (lax conv) using the same bf16 operands / f32 accumulation."""
    def prelu(v, a):
        return jnp.where(v >= 0, v, a * v)

    h = x
    for p in params:
        d = p["dilation"]
        P = (K - 1) * d
        w1 = _fused_to_conv_weight(p["w1"], K)                 # (Cout, Cin, K) bf16
        w2 = _fused_to_conv_weight(p["w2"], K)
        a1, a2, a3 = p["alphas"][0], p["alphas"][1], p["alphas"][2]
        h_bf = h.astype(jnp.bfloat16)

        def conv(inp_bf, w, b):
            out = lax.conv_general_dilated(
                inp_bf, w, window_strides=(1,), padding=[(P, 0)],
                rhs_dilation=(d,), dimension_numbers=("NCH", "OIH", "NCH"),
                preferred_element_type=jnp.float32)
            return out + b[None, :, :]

        h1 = prelu(conv(h_bf, w1, p["b1"]), a1)
        h2 = prelu(conv(h1.astype(jnp.bfloat16), w2, p["b2"]), a2)
        if p["has_downsample"]:
            res = jnp.einsum("oc,ncl->nol", p["wd"], h_bf,
                             preferred_element_type=jnp.float32) + p["bd"][None, :, :]
        else:
            res = h
        h = prelu(h2 + res, a3)
    return h


if __name__ == "__main__":
    key = jax.random.PRNGKey(0)
    B, num_inputs, L = 4, 8, 128
    num_channels = [16, 16]        # block 0 has a 1x1 downsample (8->16), block 1 does not
    K = 2                          # kernel_size=2, causal=True (defaults)

    kp, kx = jax.random.split(key)
    params = init_tcn_params(kp, num_inputs, num_channels, K)
    x = jax.random.normal(kx, (B, num_inputs, L), jnp.float32)

    out = tcn_forward(x, params, K=K)      # Bt chosen per TPU generation
    out = jax.block_until_ready(out)

    ref = tcn_reference(x, params, K=K)
    assert out.shape == (B, num_channels[-1], L)
    max_err = float(jnp.max(jnp.abs(out - ref)))
    # Kernel and reference use identical bf16 operands with f32 accumulation; residual
    # differences come only from f32 summation order.
    assert jnp.allclose(out, ref, atol=5e-4, rtol=5e-4), max_err

    print("KERNEL_OK")
</pallas_src>

<mosaic_0001>
module attributes {stable_mosaic.version = 11 : i64} {
  func.func @_tcn_fused_kernel(%arg0: i32, %arg1: memref<8x512xf32, #tpu.memory_space<vmem>>, %arg2: memref<16x16xbf16, #tpu.memory_space<vmem>>, %arg3: memref<16x1xf32, #tpu.memory_space<vmem>>, %arg4: memref<16x32xbf16, #tpu.memory_space<vmem>>, %arg5: memref<16x1xf32, #tpu.memory_space<vmem>>, %arg6: memref<16x8xbf16, #tpu.memory_space<vmem>>, %arg7: memref<16x1xf32, #tpu.memory_space<vmem>>, %arg8: memref<16x32xbf16, #tpu.memory_space<vmem>>, %arg9: memref<16x1xf32, #tpu.memory_space<vmem>>, %arg10: memref<16x32xbf16, #tpu.memory_space<vmem>>, %arg11: memref<16x1xf32, #tpu.memory_space<vmem>>, %arg12: memref<6xf32, #tpu.memory_space<smem>>, %arg13: memref<16x512xf32, #tpu.memory_space<vmem>>) attributes {dimension_semantics = [#tpu.dimension_semantics<parallel>], iteration_bounds = array<i64: 1>, scalar_prefetch = 0 : i64, scratch_operands = 0 : i64, tpu.core_type = #tpu.core_type<tc>, window_params = [{transform_indices = @transform_0, window_bounds = array<i64: 8, 512>}, {pipeline_mode = #tpu.pipeline_mode<synchronous>, transform_indices = @transform_1, window_bounds = array<i64: 16, 16>}, {pipeline_mode = #tpu.pipeline_mode<synchronous>, transform_indices = @transform_2, window_bounds = array<i64: 16, 1>}, {pipeline_mode = #tpu.pipeline_mode<synchronous>, transform_indices = @transform_3, window_bounds = array<i64: 16, 32>}, {pipeline_mode = #tpu.pipeline_mode<synchronous>, transform_indices = @transform_4, window_bounds = array<i64: 16, 1>}, {pipeline_mode = #tpu.pipeline_mode<synchronous>, transform_indices = @transform_5, window_bounds = array<i64: 16, 8>}, {pipeline_mode = #tpu.pipeline_mode<synchronous>, transform_indices = @transform_6, window_bounds = array<i64: 16, 1>}, {pipeline_mode = #tpu.pipeline_mode<synchronous>, transform_indices = @transform_7, window_bounds = array<i64: 16, 32>}, {pipeline_mode = #tpu.pipeline_mode<synchronous>, transform_indices = @transform_8, window_bounds = array<i64: 16, 1>}, {pipeline_mode = #tpu.pipeline_mode<synchronous>, transform_indices = @transform_9, window_bounds = array<i64: 16, 32>}, {pipeline_mode = #tpu.pipeline_mode<synchronous>, transform_indices = @transform_10, window_bounds = array<i64: 16, 1>}, {transform_indices = @transform_11, window_bounds = array<i64: 6>}, {transform_indices = @transform_12, window_bounds = array<i64: 16, 512>}]} {
    %0 = tpu.iota {dimensions = array<i32: 1>} : vector<1x512xi32>
    %c128_i32 = arith.constant 128 : i32
    %c0_i32 = arith.constant 0 : i32
    %1 = arith.cmpi eq, %c128_i32, %c0_i32 : i32
    %c1_i32 = arith.constant 1 : i32
    %2 = arith.select %1, %c1_i32, %c128_i32 : i32
    %3 = vector.broadcast %2 : i32 to vector<1x512xi32>
    %4 = arith.remsi %0, %3 : vector<1x512xi32>
    %c0_i32_0 = arith.constant 0 : i32
    %5 = vector.broadcast %c0_i32_0 : i32 to vector<1x512xi32>
    %6 = arith.cmpi ne, %4, %5 : vector<1x512xi32>
    %c0_i32_1 = arith.constant 0 : i32
    %7 = vector.broadcast %c0_i32_1 : i32 to vector<1x512xi32>
    %8 = arith.cmpi slt, %4, %7 : vector<1x512xi32>
    %c0_i32_2 = arith.constant 0 : i32
    %9 = arith.cmpi slt, %2, %c0_i32_2 : i32
    %10 = vector.broadcast %9 : i1 to vector<1x512xi1>
    %11 = vector.broadcast %10 : vector<1x512xi1> to vector<1x512xi1>
    %12 = arith.xori %8, %11 : vector<1x512xi1>
    %13 = arith.andi %12, %6 : vector<1x512xi1>
    %14 = vector.broadcast %2 : i32 to vector<1x512xi32>
    %15 = arith.addi %4, %14 : vector<1x512xi32>
    %16 = arith.select %13, %15, %4 : vector<1x512xi1>, vector<1x512xi32>
    %c1_i32_3 = arith.constant 1 : i32
    %17 = vector.broadcast %c1_i32_3 : i32 to vector<1x512xi32>
    %18 = arith.cmpi sge, %16, %17 : vector<1x512xi32>
    %c2_i32 = arith.constant 2 : i32
    %19 = vector.broadcast %c2_i32 : i32 to vector<1x512xi32>
    %20 = arith.cmpi sge, %16, %19 : vector<1x512xi32>
    %c0 = arith.constant 0 : index
    %c0_4 = arith.constant 0 : index
    %21 = vector.load %arg1[%c0, %c0_4] : memref<8x512xf32, #tpu.memory_space<vmem>>, vector<8x512xf32>
    %c0_5 = arith.constant 0 : index
    %22 = memref.load %arg12[%c0_5] : memref<6xf32, #tpu.memory_space<smem>>
    %c1 = arith.constant 1 : index
    %23 = memref.load %arg12[%c1] : memref<6xf32, #tpu.memory_space<smem>>
    %c2 = arith.constant 2 : index
    %24 = memref.load %arg12[%c2] : memref<6xf32, #tpu.memory_space<smem>>
    %c1_i32_6 = arith.constant 1 : i32
    %25 = tpu.dynamic_rotate %21 by %c1_i32_6 dim 1 : vector<8x512xf32>, i32 -> vector<8x512xf32>
    %cst = arith.constant 0.000000e+00 : f32
    %26 = vector.shape_cast %18 : vector<1x512xi1> to vector<1x512xi1>
    %27 = vector.broadcast %26 : vector<1x512xi1> to vector<8x512xi1>
    %28 = vector.broadcast %cst : f32 to vector<8x512xf32>
    %29 = arith.select %27, %25, %28 : vector<8x512xi1>, vector<8x512xf32>
    %30 = tpu.concatenate %29, %21 in 0 : vector<8x512xf32>, vector<8x512xf32> -> vector<16x512xf32>
    %c0_7 = arith.constant 0 : index
    %c0_8 = arith.constant 0 : index
    %31 = vector.load %arg2[%c0_7, %c0_8] : memref<16x16xbf16, #tpu.memory_space<vmem>>, vector<16x16xbf16>
    %32 = arith.truncf %30 : vector<16x512xf32> to vector<16x512xbf16>
    %cst_9 = arith.constant dense<0.000000e+00> : vector<16x512xf32>
    %33 = tpu.matmul %31, %32, %cst_9 {dimension_numbers = #tpu.dot_dimension_numbers<[1], [0], [0], [1], [0, 0, 1, 1], [], []>} : vector<16x16xbf16>, vector<16x512xbf16>, vector<16x512xf32> -> vector<16x512xf32>
    %c0_10 = arith.constant 0 : index
    %c0_11 = arith.constant 0 : index
    %34 = vector.load %arg3[%c0_10, %c0_11] : memref<16x1xf32, #tpu.memory_space<vmem>>, vector<16x1xf32>
    %35 = vector.broadcast %34 : vector<16x1xf32> to vector<16x512xf32>
    %36 = arith.addf %33, %35 : vector<16x512xf32>
    %cst_12 = arith.constant 0.000000e+00 : f32
    %37 = vector.broadcast %cst_12 : f32 to vector<16x512xf32>
    %38 = arith.cmpf oge, %36, %37 : vector<16x512xf32>
    %39 = vector.broadcast %22 : f32 to vector<16x512xf32>
    %40 = arith.mulf %39, %36 : vector<16x512xf32>
    %41 = arith.select %38, %36, %40 : vector<16x512xi1>, vector<16x512xf32>
    %c1_i32_13 = arith.constant 1 : i32
    %42 = tpu.dynamic_rotate %41 by %c1_i32_13 dim 1 : vector<16x512xf32>, i32 -> vector<16x512xf32>
    %cst_14 = arith.constant 0.000000e+00 : f32
    %43 = vector.shape_cast %18 : vector<1x512xi1> to vector<1x512xi1>
    %44 = vector.broadcast %43 : vector<1x512xi1> to vector<16x512xi1>
    %45 = vector.broadcast %cst_14 : f32 to vector<16x512xf32>
    %46 = arith.select %44, %42, %45 : vector<16x512xi1>, vector<16x512xf32>
    %47 = tpu.concatenate %46, %41 in 0 : vector<16x512xf32>, vector<16x512xf32> -> vector<32x512xf32>
    %c0_15 = arith.constant 0 : index
    %c0_16 = arith.constant 0 : index
    %48 = vector.load %arg4[%c0_15, %c0_16] : memref<16x32xbf16, #tpu.memory_space<vmem>>, vector<16x32xbf16>
    %49 = arith.truncf %47 : vector<32x512xf32> to vector<32x512xbf16>
    %cst_17 = arith.constant dense<0.000000e+00> : vector<16x512xf32>
    %50 = tpu.matmul %48, %49, %cst_17 {dimension_numbers = #tpu.dot_dimension_numbers<[1], [0], [0], [1], [0, 0, 1, 1], [], []>} : vector<16x32xbf16>, vector<32x512xbf16>, vector<16x512xf32> -> vector<16x512xf32>
    %c0_18 = arith.constant 0 : index
    %c0_19 = arith.constant 0 : index
    %51 = vector.load %arg5[%c0_18, %c0_19] : memref<16x1xf32, #tpu.memory_space<vmem>>, vector<16x1xf32>
    %52 = vector.broadcast %51 : vector<16x1xf32> to vector<16x512xf32>
    %53 = arith.addf %50, %52 : vector<16x512xf32>
    %cst_20 = arith.constant 0.000000e+00 : f32
    %54 = vector.broadcast %cst_20 : f32 to vector<16x512xf32>
    %55 = arith.cmpf oge, %53, %54 : vector<16x512xf32>
    %56 = vector.broadcast %23 : f32 to vector<16x512xf32>
    %57 = arith.mulf %56, %53 : vector<16x512xf32>
    %58 = arith.select %55, %53, %57 : vector<16x512xi1>, vector<16x512xf32>
    %c0_21 = arith.constant 0 : index
    %c0_22 = arith.constant 0 : index
    %59 = vector.load %arg6[%c0_21, %c0_22] : memref<16x8xbf16, #tpu.memory_space<vmem>>, vector<16x8xbf16>
    %60 = arith.truncf %21 : vector<8x512xf32> to vector<8x512xbf16>
    %cst_23 = arith.constant dense<0.000000e+00> : vector<16x512xf32>
    %61 = tpu.matmul %59, %60, %cst_23 {dimension_numbers = #tpu.dot_dimension_numbers<[1], [0], [0], [1], [0, 0, 1, 1], [], []>} : vector<16x8xbf16>, vector<8x512xbf16>, vector<16x512xf32> -> vector<16x512xf32>
    %c0_24 = arith.constant 0 : index
    %c0_25 = arith.constant 0 : index
    %62 = vector.load %arg7[%c0_24, %c0_25] : memref<16x1xf32, #tpu.memory_space<vmem>>, vector<16x1xf32>
    %63 = vector.broadcast %62 : vector<16x1xf32> to vector<16x512xf32>
    %64 = arith.addf %61, %63 : vector<16x512xf32>
    %65 = arith.addf %58, %64 : vector<16x512xf32>
    %cst_26 = arith.constant 0.000000e+00 : f32
    %66 = vector.broadcast %cst_26 : f32 to vector<16x512xf32>
    %67 = arith.cmpf oge, %65, %66 : vector<16x512xf32>
    %68 = vector.broadcast %24 : f32 to vector<16x512xf32>
    %69 = arith.mulf %68, %65 : vector<16x512xf32>
    %70 = arith.select %67, %65, %69 : vector<16x512xi1>, vector<16x512xf32>
    %c3 = arith.constant 3 : index
    %71 = memref.load %arg12[%c3] : memref<6xf32, #tpu.memory_space<smem>>
    %c4 = arith.constant 4 : index
    %72 = memref.load %arg12[%c4] : memref<6xf32, #tpu.memory_space<smem>>
    %c5 = arith.constant 5 : index
    %73 = memref.load %arg12[%c5] : memref<6xf32, #tpu.memory_space<smem>>
    %c2_i32_27 = arith.constant 2 : i32
    %74 = tpu.dynamic_rotate %70 by %c2_i32_27 dim 1 : vector<16x512xf32>, i32 -> vector<16x512xf32>
    %cst_28 = arith.constant 0.000000e+00 : f32
    %75 = vector.shape_cast %20 : vector<1x512xi1> to vector<1x512xi1>
    %76 = vector.broadcast %75 : vector<1x512xi1> to vector<16x512xi1>
    %77 = vector.broadcast %cst_28 : f32 to vector<16x512xf32>
    %78 = arith.select %76, %74, %77 : vector<16x512xi1>, vector<16x512xf32>
    %79 = tpu.concatenate %78, %70 in 0 : vector<16x512xf32>, vector<16x512xf32> -> vector<32x512xf32>
    %c0_29 = arith.constant 0 : index
    %c0_30 = arith.constant 0 : index
    %80 = vector.load %arg8[%c0_29, %c0_30] : memref<16x32xbf16, #tpu.memory_space<vmem>>, vector<16x32xbf16>
    %81 = arith.truncf %79 : vector<32x512xf32> to vector<32x512xbf16>
    %cst_31 = arith.constant dense<0.000000e+00> : vector<16x512xf32>
    %82 = tpu.matmul %80, %81, %cst_31 {dimension_numbers = #tpu.dot_dimension_numbers<[1], [0], [0], [1], [0, 0, 1, 1], [], []>} : vector<16x32xbf16>, vector<32x512xbf16>, vector<16x512xf32> -> vector<16x512xf32>
    %c0_32 = arith.constant 0 : index
    %c0_33 = arith.constant 0 : index
    %83 = vector.load %arg9[%c0_32, %c0_33] : memref<16x1xf32, #tpu.memory_space<vmem>>, vector<16x1xf32>
    %84 = vector.broadcast %83 : vector<16x1xf32> to vector<16x512xf32>
    %85 = arith.addf %82, %84 : vector<16x512xf32>
    %cst_34 = arith.constant 0.000000e+00 : f32
    %86 = vector.broadcast %cst_34 : f32 to vector<16x512xf32>
    %87 = arith.cmpf oge, %85, %86 : vector<16x512xf32>
    %88 = vector.broadcast %71 : f32 to vector<16x512xf32>
    %89 = arith.mulf %88, %85 : vector<16x512xf32>
    %90 = arith.select %87, %85, %89 : vector<16x512xi1>, vector<16x512xf32>
    %c2_i32_35 = arith.constant 2 : i32
    %91 = tpu.dynamic_rotate %90 by %c2_i32_35 dim 1 : vector<16x512xf32>, i32 -> vector<16x512xf32>
    %cst_36 = arith.constant 0.000000e+00 : f32
    %92 = vector.shape_cast %20 : vector<1x512xi1> to vector<1x512xi1>
    %93 = vector.broadcast %92 : vector<1x512xi1> to vector<16x512xi1>
    %94 = vector.broadcast %cst_36 : f32 to vector<16x512xf32>
    %95 = arith.select %93, %91, %94 : vector<16x512xi1>, vector<16x512xf32>
    %96 = tpu.concatenate %95, %90 in 0 : vector<16x512xf32>, vector<16x512xf32> -> vector<32x512xf32>
    %c0_37 = arith.constant 0 : index
    %c0_38 = arith.constant 0 : index
    %97 = vector.load %arg10[%c0_37, %c0_38] : memref<16x32xbf16, #tpu.memory_space<vmem>>, vector<16x32xbf16>
    %98 = arith.truncf %96 : vector<32x512xf32> to vector<32x512xbf16>
    %cst_39 = arith.constant dense<0.000000e+00> : vector<16x512xf32>
    %99 = tpu.matmul %97, %98, %cst_39 {dimension_numbers = #tpu.dot_dimension_numbers<[1], [0], [0], [1], [0, 0, 1, 1], [], []>} : vector<16x32xbf16>, vector<32x512xbf16>, vector<16x512xf32> -> vector<16x512xf32>
    %c0_40 = arith.constant 0 : index
    %c0_41 = arith.constant 0 : index
    %100 = vector.load %arg11[%c0_40, %c0_41] : memref<16x1xf32, #tpu.memory_space<vmem>>, vector<16x1xf32>
    %101 = vector.broadcast %100 : vector<16x1xf32> to vector<16x512xf32>
    %102 = arith.addf %99, %101 : vector<16x512xf32>
    %cst_42 = arith.constant 0.000000e+00 : f32
    %103 = vector.broadcast %cst_42 : f32 to vector<16x512xf32>
    %104 = arith.cmpf oge, %102, %103 : vector<16x512xf32>
    %105 = vector.broadcast %72 : f32 to vector<16x512xf32>
    %106 = arith.mulf %105, %102 : vector<16x512xf32>
    %107 = arith.select %104, %102, %106 : vector<16x512xi1>, vector<16x512xf32>
    %108 = arith.addf %107, %70 : vector<16x512xf32>
    %cst_43 = arith.constant 0.000000e+00 : f32
    %109 = vector.broadcast %cst_43 : f32 to vector<16x512xf32>
    %110 = arith.cmpf oge, %108, %109 : vector<16x512xf32>
    %111 = vector.broadcast %73 : f32 to vector<16x512xf32>
    %112 = arith.mulf %111, %108 : vector<16x512xf32>
    %113 = arith.select %110, %108, %112 : vector<16x512xi1>, vector<16x512xf32>
    %c0_44 = arith.constant 0 : index
    %c0_45 = arith.constant 0 : index
    %114 = vector.load %arg13[%c0_44, %c0_45] : memref<16x512xf32, #tpu.memory_space<vmem>>, vector<16x512xf32>
    tpu.vector_store %arg13[%c0_44, %c0_45], %113 {strides = array<i32>} : memref<16x512xf32, #tpu.memory_space<vmem>>, vector<16x512xf32>,
    return
  }
  func.func @transform_0(%arg0: i32) -> (i32, i32) {
    %c0_i32 = arith.constant 0 : i32
    %c0_i32_0 = arith.constant 0 : i32
    return %c0_i32, %arg0 : i32, i32
  }
  func.func @transform_1(%arg0: i32) -> (i32, i32) {
    %c0_i32 = arith.constant 0 : i32
    %c0_i32_0 = arith.constant 0 : i32
    %c0_i32_1 = arith.constant 0 : i32
    return %c0_i32, %c0_i32_0 : i32, i32
  }
  func.func @transform_2(%arg0: i32) -> (i32, i32) {
    %c0_i32 = arith.constant 0 : i32
    %c0_i32_0 = arith.constant 0 : i32
    %c0_i32_1 = arith.constant 0 : i32
    return %c0_i32, %c0_i32_0 : i32, i32
  }
  func.func @transform_3(%arg0: i32) -> (i32, i32) {
    %c0_i32 = arith.constant 0 : i32
    %c0_i32_0 = arith.constant 0 : i32
    %c0_i32_1 = arith.constant 0 : i32
    return %c0_i32, %c0_i32_0 : i32, i32
  }
  func.func @transform_4(%arg0: i32) -> (i32, i32) {
    %c0_i32 = arith.constant 0 : i32
    %c0_i32_0 = arith.constant 0 : i32
    %c0_i32_1 = arith.constant 0 : i32
    return %c0_i32, %c0_i32_0 : i32, i32
  }
  func.func @transform_5(%arg0: i32) -> (i32, i32) {
    %c0_i32 = arith.constant 0 : i32
    %c0_i32_0 = arith.constant 0 : i32
    %c0_i32_1 = arith.constant 0 : i32
    return %c0_i32, %c0_i32_0 : i32, i32
  }
  func.func @transform_6(%arg0: i32) -> (i32, i32) {
    %c0_i32 = arith.constant 0 : i32
    %c0_i32_0 = arith.constant 0 : i32
    %c0_i32_1 = arith.constant 0 : i32
    return %c0_i32, %c0_i32_0 : i32, i32
  }
  func.func @transform_7(%arg0: i32) -> (i32, i32) {
    %c0_i32 = arith.constant 0 : i32
    %c0_i32_0 = arith.constant 0 : i32
    %c0_i32_1 = arith.constant 0 : i32
    return %c0_i32, %c0_i32_0 : i32, i32
  }
  func.func @transform_8(%arg0: i32) -> (i32, i32) {
    %c0_i32 = arith.constant 0 : i32
    %c0_i32_0 = arith.constant 0 : i32
    %c0_i32_1 = arith.constant 0 : i32
    return %c0_i32, %c0_i32_0 : i32, i32
  }
  func.func @transform_9(%arg0: i32) -> (i32, i32) {
    %c0_i32 = arith.constant 0 : i32
    %c0_i32_0 = arith.constant 0 : i32
    %c0_i32_1 = arith.constant 0 : i32
    return %c0_i32, %c0_i32_0 : i32, i32
  }
  func.func @transform_10(%arg0: i32) -> (i32, i32) {
    %c0_i32 = arith.constant 0 : i32
    %c0_i32_0 = arith.constant 0 : i32
    %c0_i32_1 = arith.constant 0 : i32
    return %c0_i32, %c0_i32_0 : i32, i32
  }
  func.func @transform_11(%arg0: i32) -> i32 {
    %c0_i32 = arith.constant 0 : i32
    %c0_i32_0 = arith.constant 0 : i32
    return %c0_i32 : i32
  }
  func.func @transform_12(%arg0: i32) -> (i32, i32) {
    %c0_i32 = arith.constant 0 : i32
    %c0_i32_0 = arith.constant 0 : i32
    return %c0_i32, %arg0 : i32, i32
  }
}

</mosaic_0001>

<bundles_post_ra>
// kernel: tpu_custom_call.1
= control target key start
LH: loop header
LB: loop body
LE: loop exit
PB: predicated region body
PF: predicated region fallthrough
CT: control target
= control target key end

     0   :  { %17 = vsyncpa [#allocation4], 0  ;;  %s1705_s0 = inlined_call_operand.vmem [shape: f32[8,512], index: 0, kind: input, shape index: {}]   ;;  %s1706_s1 = inlined_call_operand.vmem [shape: bf16[16,16], index: 1, kind: input, shape index: {}]   ;;  %s1707_s2 = inlined_call_operand.vmem [shape: f32[16,1], index: 2, kind: input, shape index: {}]   ;;  %s1708_s3 = inlined_call_operand.vmem [shape: bf16[16,32], index: 3, kind: input, shape index: {}]   ;;  %s1709_s4 = inlined_call_operand.vmem [shape: f32[16,1], index: 4, kind: input, shape index: {}]   ;;  %s1710_s5 = inlined_call_operand.vmem [shape: bf16[16,8], index: 5, kind: input, shape index: {}]   ;;  %s1711_s6 = inlined_call_operand.vmem [shape: f32[16,1], index: 6, kind: input, shape index: {}]   ;;  %s1712_s7 = inlined_call_operand.vmem [shape: bf16[16,32], index: 7, kind: input, shape index: {}]   ;;  %s1713_s8 = inlined_call_operand.vmem [shape: f32[16,1], index: 8, kind: input, shape index: {}]   ;;  %s1714_s9 = inlined_call_operand.vmem [shape: bf16[16,32], index: 9, kind: input, shape index: {}]   ;;  %s1715_s10 = inlined_call_operand.vmem [shape: f32[16,1], index: 10, kind: input, shape index: {}]   ;;  %s1716_s11 = inlined_call_operand.vmem [shape: f32[6], index: 11, kind: input, shape index: {}]   ;;  %s1717_s12 = inlined_call_operand.hbm [shape: f32[16,512], index: 12, kind: output, shape index: {}]  }
   0x1   :  { %18 = vsyncpa [#allocation3], 0  ;;  %s47_s23 = sshll.u32 %s1716_s11, 4  ;;  %s48_s23 = int_to_ptr.vmem [resolvable:$true] %s47_s23 }
   0x2   :  { %s1191_s24 = scalar_lea.vmem %s48_s23, 16  ;;  %p1196_p1 = scmp.lt.s32.totalorder %s48_s23, %s48_s23 }
   0x3   :  { %p1192_p0 = scmp.ne.s32.totalorder %s48_s23, %s1191_s24  ;;  %p1197_p2 = scmp.lt.s32.totalorder %s1191_s24, %s1191_s24 }
   0x5   :  { %p1198_p3 = por %p1197_p2, %p1196_p1 }
   0x7   :  { %p1199_p4 = pnand %p1198_p3, %p1192_p0 }
   0x9   :  { %1202 = shalt.err (!%p1199_p4)
}
   0xa   :  { %s1229_s25 = smov [#allocation2]  }
   0xb   :  { %50 = dma.vmem_to_smem %s48_s23, 16, %s1229_s25, [#allocation4]  }
   0xc   :  { %1225 = dma.done.wait [#allocation4], 16  }
   0xd   :  { %1226 = vsyncadd [#allocation4], 4294967280 }
   0xe   :  { %54 = sfence }
   0xf   :  { %v1308_v0 = vld [vmem:[%s1705_s0] sm:$0xff]  ;;  %v1313_v1 = vld [vmem:[%s1705_s0 + $0x8] sm:$0xff]  ;;  %v1318_v2 = vld [vmem:[%s1705_s0 + $0x10] sm:$0xff]  ;;  %v1230_v5 = vmov 0   ;;  %s1231_s15 = smov 1   ;;  %v56_v9 = vlaneseq  ;;  %vm1232_vm2 = vmmov 1  }
  0x10   :  { %v1114_v3 = vpack.i.bf16 %v1313_v1, %v1308_v0  ;;  %v1325_v4 = vld [vmem:[%s1705_s0 + $0x18] sm:$0xff]  ;;  %208 = vmatprep.mubr.bf16.mxu0 %v1230_v5  ;;  %251 = vmatprep.mubr.bf16.mxu1 %v1230_v5  ;;  %v155_v7 = vld [vmem:[%s1707_s2] sm:$0xff]  ;;  %v156_v8 = vld [vmem:[%s1707_s2 + $0x8] sm:$0xff]  ;;  %vm172_vm10 = vcmask 130048   ;;  %s121_s20 = sld [smem:[#allocation2]]  ;;  %s1036_s11 = sld [smem:[#allocation2 + $0x1]] }
  0x11   :  { %1124 = vset.pattern.permute.xlu1 %v1230_v5  ;;  %1145 = vset.pattern.permute.xlu0 %v1230_v5  ;;  %v1119_v6 = vpack.i.bf16 %v1325_v4, %v1318_v2  ;;  %v1341_v10 = vand.u32 127, %v56_v9  ;;  %v1186_v34 = vld [vmem:[%s1706_s1] sm:$0xff]   ;;  %v466_v27 = vpack.c.bf16 %v1325_v4, %v1325_v4  ;;  %s1492_s29 = sld [smem:[#allocation2 + $0x2]]  ;;  %s1073_s17 = sld [smem:[#allocation2 + $0x3]] }
  0x12   :  { %1115 = vrot.lane.b32.xlu0 %v1114_v3, %s1231_s15  ;;  %159 = vperm.xlu1 %1124, %v155_v7   ;;  %s1075_s1 = sld [smem:[#allocation2 + $0x5]] }
  0x13   :  { %v1344_v11 = vadd.s32 128, %v1341_v10  ;;  %v1348_v13 = vadd.s32 384, %v1341_v10  ;;  %v1351_v14 = vadd.s32 256, %v1341_v10  ;;  %vm132_vm1 = vcmp.lt.s32.totalorder %v1341_v10, 1 }
  0x14   :  { %vm109_vm4 = vcmp.ge.s32.totalorder %v1341_v10, 1 }
  0x15   :  { %v72_v12 = vand.u32 127, %v1344_v11  ;;  %v86_v17 = vand.u32 127, %v1348_v13  ;;  %v79_v20 = vand.u32 127, %v1351_v14  ;;  %vm1042_vm7 = vmpackc.low %vm1232_vm2, %vm109_vm4 }
  0x16   :  { %1120 = vrot.lane.b32.xlu0 %v1119_v6, %s1231_s15  ;;  %164 = vperm.xlu1 %1124, %v156_v8   ;;  %v270_v38 = vstv %s121_s20  ;;  %s1074_s20 = sld [smem:[#allocation2 + $0x4]] }
  0x17   :  { %vm1355_vm0 = vcmp.ge.s32.totalorder %v72_v12, 1  ;;  %vm1371_vm5 = vcmp.ge.s32.totalorder %v86_v17, 1  ;;  %vm1377_vm6 = vcmp.ge.s32.totalorder %v79_v20, 1 }
  0x18   :  { %vm1039_vm3 = vmpackc.low %vm1232_vm2, %vm1355_vm0 }
  0x19   :  { %vm1046_vm8 = vmpackc.low %vm1232_vm2, %vm1371_vm5 }
  0x1a   :  { %vm1049_vm9 = vmpackc.low %vm1232_vm2, %vm1377_vm6 }
  0x84   :  { %v1116_v15 = vpop.permute.xlu0 %1115 }
  0x85   :  { %v1118_v18 = vunpack.i.h.bf16 %v1116_v15  ;;  %v1117_v19 = vunpack.i.l.bf16 %v1116_v15 }
  0x87   :  { %v135_v21 = vsel %vm132_vm1, %v1117_v19, %v1118_v18 }
  0x88   :  { %v1121_v22 = vpop.permute.xlu0 %1120  ;;  %v1040_v23 = vpack.c.bf16 %v1313_v1, %v135_v21 }
  0x89   :  { %v1123_v25 = vunpack.i.h.bf16 %v1121_v22  ;;  %v1122_v26 = vunpack.i.l.bf16 %v1121_v22 }
  0x8a   :  { %1041 = vmatprep.subr.msk.bf16.mxu0 %vm1039_vm3, %v1040_v23 }
  0x8b   :  { %v136_v28 = vsel %vm132_vm1, %v1123_v25, %v1117_v19  ;;  %v133_v29 = vsel %vm132_vm1, %v1122_v26, %v1123_v25  ;;  %v134_v30 = vsel %vm132_vm1, %v1118_v18, %v1122_v26 }
  0x8c   :  { %v1043_v31 = vpack.c.bf16 %v1308_v0, %v136_v28  ;;  %v1047_v32 = vpack.c.bf16 %v1325_v4, %v133_v29  ;;  %v1050_v33 = vpack.c.bf16 %v1318_v2, %v134_v30  ;;  %v330_v29 = vld [vmem:[%s1709_s4 + $0x8] sm:$0xff]  ;;  %v467_v30 = vld [vmem:[%s1711_s6] sm:$0xff] }
  0x8e   :  { %1044 = vmatpush1.bf16.msk.msra.mxu0 %vm1042_vm7, %v1043_v31  ;;  %1048 = vmatprep.subr.msk.bf16.mxu1 %vm1046_vm8, %v1047_v32  ;;  %v329_v31 = vld [vmem:[%s1709_s4] sm:$0xff]  ;;  %v468_v32 = vld [vmem:[%s1711_s6 + $0x8] sm:$0xff]  ;;  %vm1054_vm8 = vmpackc.low %vm1355_vm0, %vm1355_vm0 }
  0x8f   :  { %1051 = vmatpush1.bf16.msk.msra.mxu1 %vm1049_vm9, %v1050_v33  ;;  %vm1057_vm9 = vmpackc.low %vm109_vm4, %vm109_vm4 }
  0x90   :  { %vm1061_vm0 = vmpackc.low %vm1371_vm5, %vm1371_vm5  ;;  %vm488_vm5 = vcmask 1043456  }
  0x91   :  { %1045 = vmatmul.mubr.msk.bf16.vlgmr.msra.gmra.mrb[0].mxu0 %vm172_vm10, %v1186_v34  ;;  %v160_v35 = vpop.permute.xlu1 %159  ;;  %vm1064_vm4 = vmpackc.low %vm1377_vm6, %vm1377_vm6  ;;  %vm484_vm6 = vcmask 64512  }
  0x92   :  { %1052 = vmatmul.mubr.msk.bf16.vlgmr.msra.gmra.mrb[0].mxu1 %vm172_vm10, %v1186_v34  ;;  %382 = vmatprep.mubr.bf16.mxu0 %v1230_v5 }
  0x93   :  { %425 = vmatprep.mubr.bf16.mxu1 %v1230_v5 }
  0x95   :  { %v165_v36 = vpop.permute.xlu1 %164 }
 0x164   :  { %v210_v37 = vpop.f32.mrb[0].mxu0 }
 0x165   :  { %v211_v39 = vadd.f32 %v210_v37, %v160_v35  ;;  %v212_v40 = vpop.f32.mrb[1].mxu0  ;;  %v253_v41 = vpop.f32.mrb[0].mxu1 }
 0x166   :  { %v213_v42 = vadd.f32 %v212_v40, %v160_v35  ;;  %v254_v43 = vadd.f32 %v253_v41, %v160_v35  ;;  %v214_v44 = vpop.f32.mrb[2].mxu0  ;;  %v255_v45 = vpop.f32.mrb[1].mxu1 }
 0x167   :  { %v271_v46 = vmul.f32 %v270_v38, %v211_v39  ;;  %v215_v47 = vadd.f32 %v214_v44, %v165_v36  ;;  %v256_v48 = vadd.f32 %v255_v45, %v160_v35  ;;  %v216_v49 = vpop.f32.mrb[3].mxu0  ;;  %v257_v50 = vpop.f32.mrb[2].mxu1  ;;  %vm262_vm11 = vcmp.ge.f32.partialorder %v211_v39, 0.0 }
 0x168   :  { %vm263_vm12 = vcmp.ge.f32.partialorder %v213_v42, 0.0  ;;  %v272_v51 = vmul.f32 %v270_v38, %v213_v42  ;;  %v259_v52 = vpop.f32.mrb[3].mxu1  ;;  %vm264_vm13 = vcmp.ge.f32.partialorder %v254_v43, 0.0  ;;  %v273_v53 = vmul.f32 %v270_v38, %v254_v43 }
 0x169   :  { %vm266_vm14 = vcmp.ge.f32.partialorder %v215_v47, 0.0  ;;  %v275_v54 = vmul.f32 %v270_v38, %v215_v47  ;;  %v274_v55 = vmul.f32 %v270_v38, %v256_v48  ;;  %v217_v56 = vadd.f32 %v216_v49, %v165_v36 }
 0x16a   :  { %v258_v57 = vadd.f32 %v257_v50, %v165_v36  ;;  %v260_v58 = vadd.f32 %v259_v52, %v165_v36  ;;  %vm265_vm15 = vcmp.ge.f32.partialorder %v256_v48, 0.0  ;;  %v1404_v59 = vsel %vm262_vm11, %v211_v39, %v271_v46 }
 0x16b   :  { %v1406_v60 = vsel %vm266_vm14, %v215_v47, %v275_v54  ;;  %v1408_v61 = vsel %vm263_vm12, %v213_v42, %v272_v51  ;;  %vm267_vm2 = vcmp.ge.f32.partialorder %v217_v56, 0.0  ;;  %v276_v62 = vmul.f32 %v270_v38, %v217_v56 }
 0x16c   :  { %vm268_vm3 = vcmp.ge.f32.partialorder %v258_v57, 0.0  ;;  %v277_v63 = vmul.f32 %v270_v38, %v258_v57  ;;  %vm269_vm7 = vcmp.ge.f32.partialorder %v260_v58, 0.0  ;;  %v278_v3 = vmul.f32 %v270_v38, %v260_v58 }
 0x16d   :  { %v1125_v6 = vpack.i.bf16 %v1406_v60, %v1404_v59  ;;  %v325_v7 = vpack.c.bf16 %v1406_v60, %v1404_v59  ;;  %v284_v8 = vsel %vm267_vm2, %v217_v56, %v276_v62  ;;  %v1415_v9 = vsel %vm264_vm13, %v254_v43, %v273_v53 }
 0x16e   :  { %v1417_v15 = vsel %vm268_vm3, %v258_v57, %v277_v63  ;;  %v282_v18 = vsel %vm265_vm15, %v256_v48, %v274_v55  ;;  %v1135_v19 = vpack.i.bf16 %v284_v8, %v1408_v61  ;;  %v286_v23 = vsel %vm269_vm7, %v260_v58, %v278_v3  ;;  %v1187_v58 = vld [vmem:[%s1708_s3] sm:$0xff]  }
 0x16f   :  { %1126 = vrot.lane.b32.xlu0 %v1125_v6, %s1231_s15  ;;  %v1130_v21 = vpack.i.bf16 %v1417_v15, %v1415_v9  ;;  %v327_v22 = vpack.c.bf16 %v1417_v15, %v1415_v9  ;;  %v1140_v25 = vpack.i.bf16 %v286_v23, %v282_v18  ;;  %v326_v26 = vpack.c.bf16 %v284_v8, %v1408_v61 }
 0x170   :  { %v328_v28 = vpack.c.bf16 %v286_v23, %v282_v18  ;;  %1136 = vrot.lane.b32.xlu1 %v1135_v19, %s1231_s15  ;;  %v464_v55 = vpack.c.bf16 %v1313_v1, %v1313_v1  ;;  %v463_v56 = vpack.c.bf16 %v1308_v0, %v1308_v0  ;;  %v465_v57 = vpack.c.bf16 %v1318_v2, %v1318_v2  ;;  %v1188_v2 = vld [vmem:[%s1710_s5] sm:$0xff]   ;;  %s1233_s5 = smov 2  }
 0x171   :  { %v444_v61 = vstv %s1036_s11 }
 0x172   :  { %v490_v0 = vsel %vm488_vm5, %v463_v56, 0  ;;  %v496_v1 = vsel %vm488_vm5, %v465_v57, 0 }
 0x173   :  { %1131 = vrot.lane.b32.xlu0 %v1130_v21, %s1231_s15 }
 0x174   :  { %1141 = vrot.lane.b32.xlu1 %v1140_v25, %s1231_s15 }
 0x177   :  { %333 = vperm.xlu0 %1145, %v329_v31  }
 0x178   :  { %338 = vperm.xlu1 %1124, %v330_v29  }
 0x17b   :  { %476 = vperm.xlu0 %1145, %v468_v32  }
 0x17c   :  { %471 = vperm.xlu1 %1124, %v467_v30  }
 0x1e1   :  { %v1127_v33 = vpop.permute.xlu0 %1126 }
 0x1e2   :  { %v1129_v34 = vunpack.i.h.bf16 %v1127_v33  ;;  %v1128_v35 = vunpack.i.l.bf16 %v1127_v33  ;;  %v1137_v36 = vpop.permute.xlu1 %1136 }
 0x1e3   :  { %v1139_v37 = vunpack.i.h.bf16 %v1137_v36  ;;  %v1138_v38 = vunpack.i.l.bf16 %v1137_v36 }
 0x1e5   :  { %v1132_v39 = vpop.permute.xlu0 %1131  ;;  %v307_v40 = vsel %vm132_vm1, %v1128_v35, %v1138_v38  ;;  %v308_v41 = vsel %vm132_vm1, %v1129_v34, %v1139_v37 }
 0x1e6   :  { %v1134_v42 = vunpack.i.h.bf16 %v1132_v39  ;;  %v1133_v43 = vunpack.i.l.bf16 %v1132_v39  ;;  %v1055_v44 = vpack.c.bf16 %v308_v41, %v307_v40  ;;  %v1142_v45 = vpop.permute.xlu1 %1141 }
 0x1e7   :  { %v1144_v46 = vunpack.i.h.bf16 %v1142_v45  ;;  %v1143_v47 = vunpack.i.l.bf16 %v1142_v45 }
 0x1e8   :  { %v306_v16 = vsel %vm132_vm1, %v1139_v37, %v1134_v42  ;;  %v305_v48 = vsel %vm132_vm1, %v1138_v38, %v1133_v43  ;;  %1056 = vmatprep.subr.msk.bf16.mxu0 %vm1054_vm8, %v1055_v44 }
 0x1e9   :  { %v303_v49 = vsel %vm132_vm1, %v1133_v43, %v1143_v47  ;;  %v304_v50 = vsel %vm132_vm1, %v1134_v42, %v1144_v46  ;;  %v309_v51 = vsel %vm132_vm1, %v1143_v47, %v1128_v35  ;;  %v310_v52 = vsel %vm132_vm1, %v1144_v46, %v1129_v34 }
 0x1ea   :  { %v1058_v53 = vpack.c.bf16 %v310_v52, %v309_v51  ;;  %v1062_v24 = vpack.c.bf16 %v304_v50, %v303_v49  ;;  %v1065_v54 = vpack.c.bf16 %v306_v16, %v305_v48  ;;  %vm1718_vm1 = vcmask 261120  }
 0x1eb   :  { %v603_v35 = vstv %s1492_s29 }
 0x1ec   :  { %1059 = vmatpush1.bf16.msk.msra.mxu0 %vm1057_vm9, %v1058_v53  ;;  %1063 = vmatprep.subr.msk.bf16.mxu1 %vm1061_vm0, %v1062_v24 }
 0x1ed   :  { %352 = vmatprep.subr.bf16.mxu0 %v326_v26  ;;  %1066 = vmatpush1.bf16.msk.msra.mxu1 %vm1064_vm4, %v1065_v54 }
 0x1ee   :  { %395 = vmatprep.subr.bf16.mxu1 %v328_v28 }
 0x1f0   :  { %353 = vmatpush1.bf16.msra.mxu0 %v325_v7 }
 0x1f1   :  { %396 = vmatpush1.bf16.msra.mxu1 %v327_v22  ;;  %1069 = vmatprep.subr.msk.bf16.mxu0 %vm488_vm5, %v464_v55 }
 0x1f2   :  { %1071 = vmatprep.subr.msk.bf16.mxu1 %vm488_vm5, %v466_v27 }
 0x1f3   :  { %1060 = vmatmul.mubr.msk.bf16.vlgmr.msra.gmra.mrb[4].mxu0 %vm1718_vm1, %v1187_v58 }
 0x1f4   :  { %1067 = vmatmul.mubr.msk.bf16.vlgmr.msra.gmra.mrb[4].mxu1 %vm1718_vm1, %v1187_v58  ;;  %502 = vmatpush1.bf16.msra.mxu0 %v490_v0 }
 0x1f5   :  { %545 = vmatpush1.bf16.msra.mxu1 %v496_v1  ;;  %533 = vmatprep.mubr.bf16.mxu0 %v1230_v5 }
 0x1f6   :  { %576 = vmatprep.mubr.bf16.mxu1 %v1230_v5  ;;  %v334_v4 = vpop.permute.xlu0 %333 }
 0x1f7   :  { %v339_v59 = vpop.permute.xlu1 %338 }
 0x1fa   :  { %v477_v36 = vpop.permute.xlu0 %476 }
 0x1fb   :  { %1070 = vmatmul.mubr.msk.bf16.vlgmr.msra.gmra.mrb[8].mxu0 %vm484_vm6, %v1188_v2  ;;  %v472_v33 = vpop.permute.xlu1 %471 }
 0x1fc   :  { %1072 = vmatmul.mubr.msk.bf16.vlgmr.msra.gmra.mrb[8].mxu1 %vm484_vm6, %v1188_v2  ;;  %726 = vmatprep.mubr.bf16.mxu0 %v1230_v5 }
 0x1fd   :  { %769 = vmatprep.mubr.bf16.mxu1 %v1230_v5 }
 0x2c6   :  { %v384_v60 = vpop.f32.mrb[4].mxu0 }
 0x2c7   :  { %v385_v62 = vadd.f32 %v384_v60, %v334_v4  ;;  %v386_v63 = vpop.f32.mrb[5].mxu0  ;;  %v427_v3 = vpop.f32.mrb[4].mxu1 }
 0x2c8   :  { %v387_v6 = vadd.f32 %v386_v63, %v334_v4  ;;  %v428_v7 = vadd.f32 %v427_v3, %v334_v4  ;;  %v388_v8 = vpop.f32.mrb[6].mxu0  ;;  %v429_v9 = vpop.f32.mrb[5].mxu1 }
 0x2c9   :  { %vm436_vm10 = vcmp.ge.f32.partialorder %v385_v62, 0.0  ;;  %v445_v15 = vmul.f32 %v444_v61, %v385_v62  ;;  %v389_v18 = vadd.f32 %v388_v8, %v339_v59  ;;  %v430_v19 = vadd.f32 %v429_v9, %v334_v4  ;;  %v390_v21 = vpop.f32.mrb[7].mxu0  ;;  %v431_v22 = vpop.f32.mrb[6].mxu1 }
 0x2ca   :  { %vm437_vm11 = vcmp.ge.f32.partialorder %v387_v6, 0.0  ;;  %v446_v23 = vmul.f32 %v444_v61, %v387_v6  ;;  %vm438_vm12 = vcmp.ge.f32.partialorder %v428_v7, 0.0  ;;  %v447_v25 = vmul.f32 %v444_v61, %v428_v7  ;;  %v433_v26 = vpop.f32.mrb[7].mxu1 }
 0x2cb   :  { %vm440_vm13 = vcmp.ge.f32.partialorder %v389_v18, 0.0  ;;  %v449_v28 = vmul.f32 %v444_v61, %v389_v18  ;;  %vm439_vm14 = vcmp.ge.f32.partialorder %v430_v19, 0.0  ;;  %v448_v29 = vmul.f32 %v444_v61, %v430_v19 }
 0x2cc   :  { %v391_v30 = vadd.f32 %v390_v21, %v339_v59  ;;  %v432_v31 = vadd.f32 %v431_v22, %v339_v59  ;;  %v434_v32 = vadd.f32 %v433_v26, %v339_v59  ;;  %v453_v34 = vsel %vm436_vm10, %v385_v62, %v445_v15 }
 0x2cd   :  { %v454_v38 = vsel %vm437_vm11, %v387_v6, %v446_v23  ;;  %v455_v39 = vsel %vm438_vm12, %v428_v7, %v447_v25  ;;  %v457_v40 = vsel %vm440_vm13, %v389_v18, %v449_v28  ;;  %v456_v41 = vsel %vm439_vm14, %v430_v19, %v448_v29 }
 0x2ce   :  { %v535_v37 = vpop.f32.mrb[8].mxu0  ;;  %vm441_vm15 = vcmp.ge.f32.partialorder %v391_v30, 0.0  ;;  %v450_v42 = vmul.f32 %v444_v61, %v391_v30  ;;  %vm442_vm2 = vcmp.ge.f32.partialorder %v432_v31, 0.0  ;;  %v451_v46 = vmul.f32 %v444_v61, %v432_v31 }
 0x2cf   :  { %v536_v43 = vadd.f32 %v535_v37, %v472_v33  ;;  %v537_v44 = vpop.f32.mrb[9].mxu0  ;;  %v578_v45 = vpop.f32.mrb[8].mxu1  ;;  %vm443_vm3 = vcmp.ge.f32.partialorder %v434_v32, 0.0  ;;  %v452_v50 = vmul.f32 %v444_v61, %v434_v32  ;;  %vm639_vm11 = vcmp.lt.s32.totalorder %v1341_v10, 2 }
 0x2d0   :  { %v538_v47 = vadd.f32 %v537_v44, %v472_v33  ;;  %v579_v16 = vadd.f32 %v578_v45, %v472_v33  ;;  %v539_v48 = vpop.f32.mrb[10].mxu0  ;;  %v580_v49 = vpop.f32.mrb[9].mxu1  ;;  %v458_v4 = vsel %vm441_vm15, %v391_v30, %v450_v42  ;;  %v459_v60 = vsel %vm442_vm2, %v432_v31, %v451_v46 }
 0x2d1   :  { %v587_v51 = vadd.f32 %v536_v43, %v453_v34  ;;  %v540_v52 = vadd.f32 %v539_v48, %v477_v36  ;;  %v581_v53 = vadd.f32 %v580_v49, %v472_v33  ;;  %v541_v24 = vpop.f32.mrb[11].mxu0  ;;  %v582_v54 = vpop.f32.mrb[10].mxu1  ;;  %v460_v61 = vsel %vm443_vm3, %v434_v32, %v452_v50 }
 0x2d2   :  { %v588_v55 = vadd.f32 %v538_v47, %v454_v38  ;;  %v589_v56 = vadd.f32 %v579_v16, %v455_v39  ;;  %v542_v27 = vadd.f32 %v541_v24, %v477_v36  ;;  %v583_v57 = vadd.f32 %v582_v54, %v477_v36  ;;  %v584_v58 = vpop.f32.mrb[11].mxu1 }
 0x2d3   :  { %v604_v0 = vmul.f32 %v603_v35, %v587_v51  ;;  %v591_v1 = vadd.f32 %v540_v52, %v457_v40  ;;  %v590_v2 = vadd.f32 %v581_v53, %v456_v41  ;;  %vm595_vm7 = vcmp.ge.f32.partialorder %v587_v51, 0.0 }
 0x2d4   :  { %v605_v62 = vmul.f32 %v603_v35, %v588_v55  ;;  %v592_v63 = vadd.f32 %v542_v27, %v458_v4  ;;  %v593_v3 = vadd.f32 %v583_v57, %v459_v60  ;;  %v585_v6 = vadd.f32 %v584_v58, %v477_v36  ;;  %v675_v36 = vld [vmem:[%s1713_s8 + $0x8] sm:$0xff] }
 0x2d5   :  { %vm599_vm8 = vcmp.ge.f32.partialorder %v591_v1, 0.0  ;;  %v608_v59 = vmul.f32 %v603_v35, %v591_v1  ;;  %vm596_vm9 = vcmp.ge.f32.partialorder %v588_v55, 0.0  ;;  %v606_v7 = vmul.f32 %v603_v35, %v589_v56 }
 0x2d6   :  { %v1501_v8 = vsel %vm595_vm7, %v587_v51, %v604_v0  ;;  %vm600_vm0 = vcmp.ge.f32.partialorder %v592_v63, 0.0  ;;  %v609_v15 = vmul.f32 %v603_v35, %v592_v63  ;;  %vm601_vm4 = vcmp.ge.f32.partialorder %v593_v3, 0.0 }
 0x2d7   :  { %v1503_v9 = vsel %vm599_vm8, %v591_v1, %v608_v59  ;;  %v610_v18 = vmul.f32 %v603_v35, %v593_v3  ;;  %vm597_vm5 = vcmp.ge.f32.partialorder %v589_v56, 0.0  ;;  %v594_v19 = vadd.f32 %v585_v6, %v460_v61  ;;  %v1189_v1 = vld [vmem:[%s1712_s7] sm:$0xff]  }
 0x2d8   :  { %v1146_v21 = vpack.i.bf16 %v1503_v9, %v1501_v8  ;;  %v607_v22 = vmul.f32 %v603_v35, %v590_v2  ;;  %v1507_v23 = vsel %vm596_vm9, %v588_v55, %v605_v62  ;;  %v1509_v25 = vsel %vm600_vm0, %v592_v63, %v609_v15 }
 0x2d9   :  { %v1511_v26 = vsel %vm601_vm4, %v593_v3, %v610_v18  ;;  %vm598_vm6 = vcmp.ge.f32.partialorder %v590_v2, 0.0  ;;  %vm602_vm10 = vcmp.ge.f32.partialorder %v594_v19, 0.0  ;;  %v611_v28 = vmul.f32 %v603_v35, %v594_v19  ;;  %v674_v35 = vld [vmem:[%s1713_s8] sm:$0xff] }
 0x2da   :  { %1147 = vrot.lane.b32.xlu1 %v1146_v21, %s1233_s5  ;;  %v1156_v29 = vpack.i.bf16 %v1509_v25, %v1507_v23  ;;  %v1516_v30 = vsel %vm597_vm5, %v589_v56, %v606_v7  ;;  %v1523_v33 = vsel %vm598_vm6, %v590_v2, %v607_v22  ;;  %vm1538_vm12 = vcmp.ge.s32.totalorder %v72_v12, 2 }
 0x2db   :  { %v1151_v31 = vpack.i.bf16 %v1511_v26, %v1516_v30  ;;  %v1521_v32 = vsel %vm602_vm10, %v594_v19, %v611_v28  ;;  %vm113_vm13 = vcmp.ge.s32.totalorder %v1341_v10, 2  ;;  %vm1077_vm14 = vmpackc.low %vm1538_vm12, %vm1538_vm12  ;;  %vm1552_vm15 = vcmp.ge.s32.totalorder %v86_v17, 2  ;;  %v1190_v10 = vld [vmem:[%s1714_s9] sm:$0xff]   ;;  %s1234_s9 = smov [#allocation5]  }
 0x2dc   :  { %1157 = vrot.lane.b32.xlu0 %v1156_v29, %s1233_s5  ;;  %v1161_v34 = vpack.i.bf16 %v1521_v32, %v1523_v33  ;;  %vm1558_vm2 = vcmp.ge.s32.totalorder %v79_v20, 2  ;;  %vm1571_vm3 = vmpackc.low %vm113_vm13, %vm113_vm13  ;;  %v671_v27 = vpack.c.bf16 %v1509_v25, %v1507_v23  ;;  %v673_v57 = vpack.c.bf16 %v1521_v32, %v1523_v33  ;;  %s1024_s21 = sshll.u32 %s1234_s9, 4  ;;  %s1025_s21 = int_to_ptr.vmem [resolvable:$true] %s1024_s21 }
 0x2dd   :  { %vm1084_vm7 = vmpackc.low %vm1552_vm15, %vm1552_vm15  ;;  %v670_v58 = vpack.c.bf16 %v1503_v9, %v1501_v8  ;;  %v672_v0 = vpack.c.bf16 %v1511_v26, %v1516_v30  ;;  %v788_v60 = vstv %s1073_s17  ;;  %s1203_s22 = scalar_lea.vmem %s1025_s21, 1024  ;;  %p1208_p6 = scmp.lt.s32.totalorder %s1025_s21, %s1025_s21 }
 0x2de   :  { %1152 = vrot.lane.b32.xlu1 %v1151_v31, %s1233_s5  ;;  %vm1087_vm8 = vmpackc.low %vm1558_vm2, %vm1558_vm2  ;;  %p1204_p5 = scmp.ne.s32.totalorder %s1025_s21, %s1203_s22  ;;  %p1209_p7 = scmp.lt.s32.totalorder %s1203_s22, %s1203_s22 }
 0x2e0   :  { %1162 = vrot.lane.b32.xlu0 %v1161_v34, %s1233_s5  ;;  %p1210_p8 = por %p1209_p7, %p1208_p6 }
 0x2e2   :  { %678 = vperm.xlu1 %1124, %v674_v35   ;;  %p1211_p9 = pnand %p1210_p8, %p1204_p5 }
 0x2e4   :  { %683 = vperm.xlu0 %1145, %v675_v36  }
 0x34c   :  { %v1148_v37 = vpop.permute.xlu1 %1147 }
 0x34d   :  { %v1150_v38 = vunpack.i.h.bf16 %v1148_v37  ;;  %v1149_v39 = vunpack.i.l.bf16 %v1148_v37 }
 0x34e   :  { %v1158_v40 = vpop.permute.xlu0 %1157 }
 0x34f   :  { %v1160_v42 = vunpack.i.h.bf16 %v1158_v40  ;;  %v1159_v43 = vunpack.i.l.bf16 %v1158_v40 }
 0x350   :  { %v1153_v44 = vpop.permute.xlu1 %1152 }
 0x351   :  { %v644_v45 = vsel %vm639_vm11, %v1149_v39, %v1159_v43  ;;  %v645_v46 = vsel %vm639_vm11, %v1150_v38, %v1160_v42  ;;  %v1155_v47 = vunpack.i.h.bf16 %v1153_v44  ;;  %v1154_v16 = vunpack.i.l.bf16 %v1153_v44 }
 0x352   :  { %v1078_v11 = vpack.c.bf16 %v645_v46, %v644_v45  ;;  %v1163_v12 = vpop.permute.xlu0 %1162 }
 0x353   :  { %v1165_v49 = vunpack.i.h.bf16 %v1163_v12  ;;  %v1164_v50 = vunpack.i.l.bf16 %v1163_v12  ;;  %v643_v52 = vsel %vm639_vm11, %v1160_v42, %v1155_v47  ;;  %v642_v53 = vsel %vm639_vm11, %v1159_v43, %v1154_v16 }
 0x354   :  { %1079 = vmatprep.subr.msk.bf16.mxu0 %vm1077_vm14, %v1078_v11  ;;  %v1088_v56 = vpack.c.bf16 %v643_v52, %v642_v53 }
 0x355   :  { %v640_v14 = vsel %vm639_vm11, %v1154_v16, %v1164_v50  ;;  %v641_v17 = vsel %vm639_vm11, %v1155_v47, %v1165_v49  ;;  %v646_v20 = vsel %vm639_vm11, %v1164_v50, %v1149_v39  ;;  %v647_v24 = vsel %vm639_vm11, %v1165_v49, %v1150_v38 }
 0x356   :  { %v1081_v54 = vpack.c.bf16 %v647_v24, %v646_v20  ;;  %v1085_v55 = vpack.c.bf16 %v641_v17, %v640_v14 }
 0x358   :  { %1082 = vmatpush1.bf16.msk.msra.mxu0 %vm1571_vm3, %v1081_v54  ;;  %1086 = vmatprep.subr.msk.bf16.mxu1 %vm1084_vm7, %v1085_v55  ;;  %v847_v54 = vld [vmem:[%s1715_s10] sm:$0xff]  ;;  %v848_v55 = vld [vmem:[%s1715_s10 + $0x8] sm:$0xff] }
 0x359   :  { %696 = vmatprep.subr.bf16.mxu0 %v671_v27  ;;  %1089 = vmatpush1.bf16.msk.msra.mxu1 %vm1087_vm8, %v1088_v56 }
 0x35a   :  { %739 = vmatprep.subr.bf16.mxu1 %v673_v57 }
 0x35c   :  { %697 = vmatpush1.bf16.msra.mxu0 %v670_v58 }
 0x35d   :  { %740 = vmatpush1.bf16.msra.mxu1 %v672_v0 }
 0x35f   :  { %1083 = vmatmul.mubr.msk.bf16.vlgmr.msra.gmra.mrb[12].mxu0 %vm1718_vm1, %v1189_v1 }
 0x360   :  { %1090 = vmatmul.mubr.msk.bf16.vlgmr.msra.gmra.mrb[12].mxu1 %vm1718_vm1, %v1189_v1  ;;  %899 = vmatprep.mubr.bf16.mxu0 %v1230_v5 }
 0x361   :  { %942 = vmatprep.mubr.bf16.mxu1 %v1230_v5  ;;  %v679_v2 = vpop.permute.xlu1 %678 }
 0x363   :  { %v684_v4 = vpop.permute.xlu0 %683 }
 0x432   :  { %v728_v59 = vpop.f32.mrb[12].mxu0 }
 0x433   :  { %v729_v61 = vadd.f32 %v728_v59, %v679_v2  ;;  %v730_v62 = vpop.f32.mrb[13].mxu0  ;;  %v771_v63 = vpop.f32.mrb[12].mxu1 }
 0x434   :  { %v731_v3 = vadd.f32 %v730_v62, %v679_v2  ;;  %v772_v6 = vadd.f32 %v771_v63, %v679_v2  ;;  %v732_v7 = vpop.f32.mrb[14].mxu0  ;;  %v773_v15 = vpop.f32.mrb[13].mxu1 }
 0x435   :  { %v789_v18 = vmul.f32 %v788_v60, %v729_v61  ;;  %v733_v19 = vadd.f32 %v732_v7, %v684_v4  ;;  %v774_v21 = vadd.f32 %v773_v15, %v679_v2  ;;  %v734_v22 = vpop.f32.mrb[15].mxu0  ;;  %v775_v28 = vpop.f32.mrb[14].mxu1  ;;  %vm780_vm9 = vcmp.ge.f32.partialorder %v729_v61, 0.0 }
 0x436   :  { %vm781_vm0 = vcmp.ge.f32.partialorder %v731_v3, 0.0  ;;  %v790_v5 = vmul.f32 %v788_v60, %v731_v3  ;;  %v777_v29 = vpop.f32.mrb[15].mxu1  ;;  %vm782_vm4 = vcmp.ge.f32.partialorder %v772_v6, 0.0  ;;  %v791_v31 = vmul.f32 %v788_v60, %v772_v6 }
 0x437   :  { %vm784_vm5 = vcmp.ge.f32.partialorder %v733_v19, 0.0  ;;  %v793_v34 = vmul.f32 %v788_v60, %v733_v19  ;;  %v792_v35 = vmul.f32 %v788_v60, %v774_v21  ;;  %v735_v36 = vadd.f32 %v734_v22, %v684_v4 }
 0x438   :  { %v776_v37 = vadd.f32 %v775_v28, %v684_v4  ;;  %v778_v38 = vadd.f32 %v777_v29, %v684_v4  ;;  %vm783_vm6 = vcmp.ge.f32.partialorder %v774_v21, 0.0  ;;  %v797_v39 = vsel %vm780_vm9, %v729_v61, %v789_v18 }
 0x439   :  { %v801_v40 = vsel %vm784_vm5, %v733_v19, %v793_v34  ;;  %v798_v42 = vsel %vm781_vm0, %v731_v3, %v790_v5  ;;  %vm785_vm10 = vcmp.ge.f32.partialorder %v735_v36, 0.0  ;;  %v794_v43 = vmul.f32 %v788_v60, %v735_v36 }
 0x43a   :  { %vm786_vm13 = vcmp.ge.f32.partialorder %v776_v37, 0.0  ;;  %v795_v44 = vmul.f32 %v788_v60, %v776_v37  ;;  %vm787_vm1 = vcmp.ge.f32.partialorder %v778_v38, 0.0  ;;  %v796_v45 = vmul.f32 %v788_v60, %v778_v38 }
 0x43b   :  { %v1166_v46 = vpack.i.bf16 %v801_v40, %v797_v39  ;;  %v843_v47 = vpack.c.bf16 %v801_v40, %v797_v39  ;;  %v802_v16 = vsel %vm785_vm10, %v735_v36, %v794_v43  ;;  %v799_v11 = vsel %vm782_vm4, %v772_v6, %v791_v31 }
 0x43c   :  { %v803_v12 = vsel %vm786_vm13, %v776_v37, %v795_v44  ;;  %v800_v49 = vsel %vm783_vm6, %v774_v21, %v792_v35  ;;  %v1176_v50 = vpack.i.bf16 %v802_v16, %v798_v42  ;;  %v804_v14 = vsel %vm787_vm1, %v778_v38, %v796_v45 }
 0x43d   :  { %1167 = vrot.lane.b32.xlu1 %v1166_v46, %s1233_s5  ;;  %v1171_v52 = vpack.i.bf16 %v803_v12, %v799_v11  ;;  %v845_v53 = vpack.c.bf16 %v803_v12, %v799_v11  ;;  %v1181_v17 = vpack.i.bf16 %v804_v14, %v800_v49  ;;  %v844_v20 = vpack.c.bf16 %v802_v16, %v798_v42 }
 0x43e   :  { %v846_v24 = vpack.c.bf16 %v804_v14, %v800_v49  ;;  %1177 = vrot.lane.b32.xlu0 %v1176_v50, %s1233_s5  ;;  %vm1733_vm1 = vcmask 261120   ;;  %v1665_v31 = vstv %s1074_s20  ;;  %v1667_v36 = vstv %s1075_s1 }
 0x441   :  { %1172 = vrot.lane.b32.xlu1 %v1171_v52, %s1233_s5 }
 0x442   :  { %1182 = vrot.lane.b32.xlu0 %v1181_v17, %s1233_s5 }
 0x445   :  { %851 = vperm.xlu1 %1124, %v847_v54  }
 0x446   :  { %856 = vperm.xlu0 %1145, %v848_v55  }
 0x4af   :  { %v1168_v56 = vpop.permute.xlu1 %1167 }
 0x4b0   :  { %v1170_v27 = vunpack.i.h.bf16 %v1168_v56  ;;  %v1169_v57 = vunpack.i.l.bf16 %v1168_v56  ;;  %v1178_v58 = vpop.permute.xlu0 %1177 }
 0x4b1   :  { %v1180_v0 = vunpack.i.h.bf16 %v1178_v58  ;;  %v1179_v1 = vunpack.i.l.bf16 %v1178_v58 }
 0x4b3   :  { %v1173_v2 = vpop.permute.xlu1 %1172  ;;  %v825_v4 = vsel %vm639_vm11, %v1169_v57, %v1179_v1  ;;  %v826_v59 = vsel %vm639_vm11, %v1170_v27, %v1180_v0 }
 0x4b4   :  { %v1175_v60 = vunpack.i.h.bf16 %v1173_v2  ;;  %v1174_v61 = vunpack.i.l.bf16 %v1173_v2  ;;  %v1093_v62 = vpack.c.bf16 %v826_v59, %v825_v4  ;;  %v1183_v63 = vpop.permute.xlu0 %1182 }
 0x4b5   :  { %v1185_v3 = vunpack.i.h.bf16 %v1183_v63  ;;  %v1184_v6 = vunpack.i.l.bf16 %v1183_v63 }
 0x4b6   :  { %v824_v7 = vsel %vm639_vm11, %v1180_v0, %v1175_v60  ;;  %v823_v15 = vsel %vm639_vm11, %v1179_v1, %v1174_v61  ;;  %1094 = vmatprep.subr.msk.bf16.mxu0 %vm1077_vm14, %v1093_v62 }
 0x4b7   :  { %v821_v18 = vsel %vm639_vm11, %v1174_v61, %v1184_v6  ;;  %v822_v19 = vsel %vm639_vm11, %v1175_v60, %v1185_v3  ;;  %v827_v21 = vsel %vm639_vm11, %v1184_v6, %v1169_v57  ;;  %v828_v22 = vsel %vm639_vm11, %v1185_v3, %v1170_v27  ;;  %vm1734_vm11 = vmmov %vm1733_vm1 }
 0x4b8   :  { %v1096_v28 = vpack.c.bf16 %v828_v22, %v827_v21  ;;  %v1100_v5 = vpack.c.bf16 %v822_v19, %v821_v18  ;;  %v1103_v29 = vpack.c.bf16 %v824_v7, %v823_v15 }
 0x4ba   :  { %1097 = vmatpush1.bf16.msk.msra.mxu0 %vm1571_vm3, %v1096_v28  ;;  %1101 = vmatprep.subr.msk.bf16.mxu1 %vm1084_vm7, %v1100_v5 }
 0x4bb   :  { %869 = vmatprep.subr.bf16.mxu0 %v844_v20  ;;  %1104 = vmatpush1.bf16.msk.msra.mxu1 %vm1087_vm8, %v1103_v29 }
 0x4bc   :  { %912 = vmatprep.subr.bf16.mxu1 %v846_v24 }
 0x4be   :  { %870 = vmatpush1.bf16.msra.mxu0 %v843_v47 }
 0x4bf   :  { %913 = vmatpush1.bf16.msra.mxu1 %v845_v53 }
 0x4c1   :  { %1098 = vmatmul.mubr.msk.bf16.vlgmr.msra.gmra.mrb[16].mxu0 %vm1733_vm1, %v1190_v10 }
 0x4c2   :  { %1105 = vmatmul.mubr.msk.bf16.vlgmr.msra.gmra.mrb[16].mxu1 %vm1734_vm11, %v1190_v10 }
 0x4c4   :  { %v852_v41 = vpop.permute.xlu1 %851 }
 0x4c5   :  { %v857_v48 = vpop.permute.xlu0 %856 }
 0x594   :  { %v901_v13 = vpop.f32.mrb[16].mxu0 }
 0x595   :  { %v902_v51 = vadd.f32 %v901_v13, %v852_v41  ;;  %v903_v34 = vpop.f32.mrb[17].mxu0  ;;  %v944_v35 = vpop.f32.mrb[16].mxu1 }
 0x596   :  { %v904_v37 = vadd.f32 %v903_v34, %v852_v41  ;;  %v945_v38 = vadd.f32 %v944_v35, %v852_v41  ;;  %v905_v39 = vpop.f32.mrb[18].mxu0  ;;  %v946_v40 = vpop.f32.mrb[17].mxu1 }
 0x597   :  { %vm953_vm12 = vcmp.ge.f32.partialorder %v902_v51, 0.0  ;;  %v962_v42 = vmul.f32 %v1665_v31, %v902_v51  ;;  %v906_v43 = vadd.f32 %v905_v39, %v857_v48  ;;  %v947_v44 = vadd.f32 %v946_v40, %v852_v41  ;;  %v907_v45 = vpop.f32.mrb[19].mxu0  ;;  %v948_v46 = vpop.f32.mrb[18].mxu1 }
 0x598   :  { %vm954_vm14 = vcmp.ge.f32.partialorder %v904_v37, 0.0  ;;  %v963_v47 = vmul.f32 %v1665_v31, %v904_v37  ;;  %vm955_vm15 = vcmp.ge.f32.partialorder %v945_v38, 0.0  ;;  %v964_v16 = vmul.f32 %v1665_v31, %v945_v38  ;;  %v950_v11 = vpop.f32.mrb[19].mxu1 }
 0x599   :  { %v970_v12 = vsel %vm953_vm12, %v902_v51, %v962_v42  ;;  %vm957_vm2 = vcmp.ge.f32.partialorder %v906_v43, 0.0  ;;  %v966_v49 = vmul.f32 %v1665_v31, %v906_v43  ;;  %vm956_vm3 = vcmp.ge.f32.partialorder %v947_v44, 0.0 }
 0x59a   :  { %v978_v50 = vadd.f32 %v970_v12, %v1501_v8  ;;  %v971_v52 = vsel %vm954_vm14, %v904_v37, %v963_v47  ;;  %v972_v53 = vsel %vm955_vm15, %v945_v38, %v964_v16  ;;  %v965_v14 = vmul.f32 %v1665_v31, %v947_v44 }
 0x59b   :  { %v979_v17 = vadd.f32 %v971_v52, %v1507_v23  ;;  %v980_v20 = vadd.f32 %v972_v53, %v1516_v30  ;;  %v974_v24 = vsel %vm957_vm2, %v906_v43, %v966_v49  ;;  %v908_v54 = vadd.f32 %v907_v45, %v857_v48 }
 0x59c   :  { %vm986_vm7 = vcmp.ge.f32.partialorder %v978_v50, 0.0  ;;  %v995_v55 = vmul.f32 %v1667_v36, %v978_v50  ;;  %v982_v56 = vadd.f32 %v974_v24, %v1503_v9  ;;  %v973_v27 = vsel %vm956_vm3, %v947_v44, %v965_v14 }
 0x59d   :  { %vm987_vm8 = vcmp.ge.f32.partialorder %v979_v17, 0.0  ;;  %v996_v57 = vmul.f32 %v1667_v36, %v979_v17  ;;  %vm988_vm9 = vcmp.ge.f32.partialorder %v980_v20, 0.0  ;;  %v997_v8 = vmul.f32 %v1667_v36, %v980_v20 }
 0x59e   :  { %v1003_v58 = vsel %vm986_vm7, %v978_v50, %v995_v55  ;;  %vm990_vm0 = vcmp.ge.f32.partialorder %v982_v56, 0.0  ;;  %v999_v23 = vmul.f32 %v1667_v36, %v982_v56  ;;  %v981_v30 = vadd.f32 %v973_v27, %v1523_v33 }
 0x59f   :  { %1011 = vst [vmem:[#allocation5] sm:$0xff] %v1003_v58  ;;  %v1004_v0 = vsel %vm987_vm8, %v979_v17, %v996_v57  ;;  %v1005_v1 = vsel %vm988_vm9, %v980_v20, %v997_v8  ;;  %vm958_vm4 = vcmp.ge.f32.partialorder %v908_v54, 0.0  ;;  %v967_v2 = vmul.f32 %v1665_v31, %v908_v54 }
 0x5a0   :  { %1012 = vst [vmem:[#allocation5 + $0x8] sm:$0xff] %v1004_v0  ;;  %1013 = vst [vmem:[#allocation5 + $0x10] sm:$0xff] %v1005_v1  ;;  %v1007_v9 = vsel %vm990_vm0, %v982_v56, %v999_v23  ;;  %vm989_vm5 = vcmp.ge.f32.partialorder %v981_v30, 0.0  ;;  %v998_v4 = vmul.f32 %v1667_v36, %v981_v30  ;;  %v949_v59 = vadd.f32 %v948_v46, %v857_v48 }
 0x5a1   :  { %1015 = vst [vmem:[#allocation5 + $0x20] sm:$0xff] %v1007_v9  ;;  %v975_v60 = vsel %vm958_vm4, %v908_v54, %v967_v2  ;;  %v951_v61 = vadd.f32 %v950_v11, %v857_v48 }
 0x5a2   :  { %v1006_v62 = vsel %vm989_vm5, %v981_v30, %v998_v4  ;;  %v983_v63 = vadd.f32 %v975_v60, %v1509_v25  ;;  %vm959_vm6 = vcmp.ge.f32.partialorder %v949_v59, 0.0  ;;  %v968_v33 = vmul.f32 %v1665_v31, %v949_v59 }
 0x5a3   :  { %1014 = vst [vmem:[#allocation5 + $0x18] sm:$0xff] %v1006_v62  ;;  %vm960_vm10 = vcmp.ge.f32.partialorder %v951_v61, 0.0  ;;  %v969_v3 = vmul.f32 %v1665_v31, %v951_v61 }
 0x5a4   :  { %vm991_vm13 = vcmp.ge.f32.partialorder %v983_v63, 0.0  ;;  %v1000_v6 = vmul.f32 %v1667_v36, %v983_v63  ;;  %v976_v7 = vsel %vm959_vm6, %v949_v59, %v968_v33 }
 0x5a5   :  { %v984_v15 = vadd.f32 %v976_v7, %v1511_v26  ;;  %v977_v18 = vsel %vm960_vm10, %v951_v61, %v969_v3 }
 0x5a6   :  { %v1008_v19 = vsel %vm991_vm13, %v983_v63, %v1000_v6  ;;  %v985_v21 = vadd.f32 %v977_v18, %v1521_v32 }
 0x5a7   :  { %1016 = vst [vmem:[#allocation5 + $0x28] sm:$0xff] %v1008_v19  ;;  %vm992_vm1 = vcmp.ge.f32.partialorder %v984_v15, 0.0  ;;  %v1001_v25 = vmul.f32 %v1667_v36, %v984_v15 }
 0x5a8   :  { %vm993_vm11 = vcmp.ge.f32.partialorder %v985_v21, 0.0  ;;  %v1002_v22 = vmul.f32 %v1667_v36, %v985_v21 }
 0x5a9   :  { %v1009_v28 = vsel %vm992_vm1, %v984_v15, %v1001_v25 }
 0x5aa   :  { %1017 = vst [vmem:[#allocation5 + $0x30] sm:$0xff] %v1009_v28  ;;  %v1010_v5 = vsel %vm993_vm11, %v985_v21, %v1002_v22 }
 0x5ab   :  { %1018 = vst [vmem:[#allocation5 + $0x38] sm:$0xff] %v1010_v5 }
 0x5ac   :  { %1214 = shalt.err (!%p1211_p9)
}
 0x5ad   :  { %s1215_s25 = scalar_lea.hbm %s1717_s12, 1024 }
 0x5ae   :  { %p1216_p10 = scmp.ne.s32.totalorder %s1717_s12, %s1215_s25  ;;  %p1219_p11 = scmp.lt.u32.totalorder %s1215_s25, %s1717_s12 }
 0x5b0   :  { %p1221_p12 = pnand %p1219_p11, %p1216_p10 }
 0x5b2   :  { %1224 = shalt.err (!%p1221_p12)
}
 0x5b3   :  { %s1235_s3 = smov 512   ;;  %s1236_s28 = smov 32  }
 0x5b4   :  { %1030 = dma.vmem_to_hbm [thread:$0]  %s1025_s21, 1024, %s1717_s12, [#allocation3], %s1235_s3, %s1235_s3, %s1236_s28  }
 0x5b5   :  { %1227 = dma.done.wait [#allocation3], 1024  }
 0x5b6   :  { %1228 = vsyncadd [#allocation3], 4294966272 }
 0x5b7   :  { %1034 = vsyncpa [#allocation3], 1 }
 0x5b8   :  { %1035 = vsyncpa [#allocation4], 1 }

</bundles_post_ra>
